<compile_context>
chip_gen: v5e
topology: v5e:2x2
jax: 0.10.0
libtpu: 0.0.40
codegen_flags: <defaults>
</compile_context>

<pallas_src>
import jax
import jax.numpy as jnp
from jax.experimental import pallas as pl
from jax.experimental.pallas import tpu as pltpu

# ---- static shape config implied by the module ------------------------------
C_IN, C1, C2 = 4, 16, 25          # conv channels
K1, S1, K2 = 4, 4, 4              # kernel / stride sizes
H_IN = 984                        # sequence length fed to conv1
L1 = (H_IN - K1) // S1 + 1        # 246 (conv1 output length)
L2 = L1 - K2 + 1                  # 243 = 81 * 3 (conv2 output length)

L1P = 256                         # L1 padded: multiple of 8, >= L2P + K2 - 1
L2P = 248                         # conv2 rows computed (>= L2, multiple of 8)
CK1 = C_IN * K1                   # 16  (conv1 im2col contraction dim)
CK2 = C1 * K2                     # 64  (conv2 im2col contraction dim)
C2P = 128                         # conv2 out channels padded to a full lane tile


# ------------------------------ Pallas kernel --------------------------------
def embed_pallas(x1p, w1m, b1, w2f, b2p):
    # x1p : (B, L1P, CK1)  bf16   padded im2col'd conv1 input
    # w1m : (CK1, C1)      bf16   conv1 weight as a matmul matrix
    # b1  : (1, C1)        f32
    # w2f : (CK2, C2P)     bf16   fused conv2 weight (cols >= C2 are zero)
    # b2p : (1, C2P)       f32
    B = x1p.shape[0]
    G = 2 if (B % 2 == 0 and B >= 2) else 1   # shard across 2 TCs on v7x
    BPC = B // G                              # batches per grid step

    def kernel(x_ref, w1_ref, b1_ref, w2_ref, b2_ref, out_ref):
        w1 = w1_ref[...]
        w2 = w2_ref[...]
        bias1 = b1_ref[...]
        bias2 = b2_ref[...]
        for b in range(BPC):                   # static unroll; BPC is tiny
            # conv1 + bias + ReLU : one MXU matmul, VPU work in f32
            h = jnp.dot(x_ref[b], w1, preferred_element_type=jnp.float32)
            h = jnp.maximum(h + bias1, 0.0)    # (L1P, C1) f32
            # conv2 fused: build (L2P, 64) im2col once, single K=64 matmul.
            # Slices stay inside this batch's rows (no cross-batch reads).
            h2 = jnp.concatenate([h[k:k + L2P, :] for k in range(K2)],
                                 axis=-1).astype(jnp.bfloat16)
            acc = jnp.dot(h2, w2, preferred_element_type=jnp.float32)
            out_ref[b] = acc + bias2           # lane-dense (L2P, 128) store

    flops = 2 * B * (L1P * CK1 * C1 + L2P * CK2 * C2P)
    bytes_accessed = (x1p.size * x1p.dtype.itemsize
                      + w1m.size * w1m.dtype.itemsize
                      + w2f.size * w2f.dtype.itemsize
                      + b1.size * 4 + b2p.size * 4
                      + B * L2P * C2P * 4)

    return pl.pallas_call(
        kernel,
        out_shape=jax.ShapeDtypeStruct((B, L2P, C2P), jnp.float32),
        grid_spec=pltpu.PrefetchScalarGridSpec(
            num_scalar_prefetch=0,
            grid=(G,),
            in_specs=[
                pl.BlockSpec((BPC, L1P, CK1), lambda g: (g, 0, 0)),
                pl.BlockSpec((CK1, C1), lambda g: (0, 0)),
                pl.BlockSpec((1, C1), lambda g: (0, 0)),
                pl.BlockSpec((CK2, C2P), lambda g: (0, 0)),
                pl.BlockSpec((1, C2P), lambda g: (0, 0)),
            ],
            out_specs=pl.BlockSpec((BPC, L2P, C2P), lambda g: (g, 0, 0)),
        ),
        compiler_params=pltpu.CompilerParams(
            dimension_semantics=("parallel",)),
        cost_estimate=pl.CostEstimate(flops=flops, transcendentals=0,
                                      bytes_accessed=bytes_accessed),
    )(x1p, w1m, b1, w2f, b2p)


# --------------------------- input / weight prep -----------------------------
def _prep_embed_inputs(x_bch, w1, b1, w2, b2):
    B = x_bch.shape[0]
    # conv1 im2col (kernel == stride): (B, L1, CK1); pad L1 -> L1P; bf16 operands
    x1 = x_bch.reshape(B, C_IN, L1, K1).transpose(0, 2, 1, 3).reshape(B, L1, CK1)
    x1p = jnp.pad(x1, ((0, 0), (0, L1P - L1), (0, 0))).astype(jnp.bfloat16)
    # conv1 weight as matmul matrix: w1m[i*K1+j, o] = w1[o, i, j]
    w1m = w1.reshape(C1, CK1).T.astype(jnp.bfloat16)
    b1r = b1.reshape(1, C1).astype(jnp.float32)
    # fused conv2 weight: w2f[k*C1 + i, o] = w2[o, i, k]; pad lanes 25 -> 128
    w2f = jnp.transpose(w2, (2, 1, 0)).reshape(CK2, C2)
    w2f = jnp.pad(w2f, ((0, 0), (0, C2P - C2))).astype(jnp.bfloat16)
    b2p = jnp.pad(b2, (0, C2P - C2)).reshape(1, C2P).astype(jnp.float32)
    return x1p, w1m, b1r, w2f, b2p


# ------------------------------ parameters -----------------------------------
def init_params(key):
    # PyTorch Conv1d default init: U(-1/sqrt(fan_in), 1/sqrt(fan_in))
    k1, k2, k3, k4 = jax.random.split(key, 4)
    bnd1 = 1.0 / float((C_IN * K1) ** 0.5)
    bnd2 = 1.0 / float((C1 * K2) ** 0.5)
    w1 = jax.random.uniform(k1, (C1, C_IN, K1), jnp.float32, -bnd1, bnd1)
    b1 = jax.random.uniform(k2, (C1,), jnp.float32, -bnd1, bnd1)
    w2 = jax.random.uniform(k3, (C2, C1, K2), jnp.float32, -bnd2, bnd2)
    b2 = jax.random.uniform(k4, (C2,), jnp.float32, -bnd2, bnd2)
    return w1, b1, w2, b2


# ------------------------------ full forward ---------------------------------
def net_forward(x, params):
    w1, b1, w2, b2 = params
    x = x.astype(jnp.float32)
    B, C, H, W = x.shape
    # rearrange 'b c h w -> b (w c) h'
    x_bch = jnp.transpose(x, (0, 3, 1, 2)).reshape(B, W * C, H)      # (B, 4, 984)

    y = embed_pallas(*_prep_embed_inputs(x_bch, w1, b1, w2, b2))     # (B, L2P, 128)
    y = y[:, :L2, :C2]                                               # (B, 243, 25)
    y = jnp.transpose(y, (0, 2, 1))                                  # (B, 25, 243) torch layout

    # rearrange 'b (h p) c -> b c h p', p=5
    y = y.reshape(B, 5, 5, L2).transpose(0, 3, 1, 2)                 # (B, 243, 5, 5)
    # rearrange 'b (p c) h w -> b c (p h) w', p=9
    y = y.reshape(B, 9, 27, 5, 5).transpose(0, 2, 1, 3, 4).reshape(B, 27, 45, 5)
    # rearrange 'b (p c) h w -> b c h (p w)', p=9
    y = y.reshape(B, 9, 3, 45, 5).transpose(0, 2, 3, 1, 4).reshape(B, 3, 45, 45)
    # TODO(synk): self.dat(...) (DAT backbone) definition not provided; returning its input.
    return y


# ------------------------------ reference check ------------------------------
def _ref_embed(x_bch, w1, b1, w2, b2):
    # Quantize operands to bf16 exactly where the Pallas kernel does, then run
    # the convolutions in f32 so only accumulation order differs.
    q = lambda a: a.astype(jnp.bfloat16).astype(jnp.float32)
    h = jax.lax.conv_general_dilated(q(x_bch), q(w1), (S1,), 'VALID',
                                     dimension_numbers=('NCH', 'OIH', 'NCH'))
    h = jnp.maximum(h + b1[None, :, None], 0.0)
    o = jax.lax.conv_general_dilated(q(h), q(w2), (1,), 'VALID',
                                     dimension_numbers=('NCH', 'OIH', 'NCH'))
    return o + b2[None, :, None]


if __name__ == "__main__":
    key = jax.random.PRNGKey(0)
    kx, kp = jax.random.split(key)
    # Input consistent with the module: NCHW with W*C = 4 (Conv1d in_channels)
    # and H = 984 so that the chained rearranges yield a (B, 3, 45, 45) tensor
    # matching DAT(img_size=45).
    x = jax.random.normal(kx, (2, C_IN, H_IN, 1), dtype=jnp.float32)
    params = init_params(kp)

    out = net_forward(x, params)
    out = jax.block_until_ready(out)
    assert out.shape == (2, 3, 45, 45), out.shape

    # cross-check the Pallas embed path against a pure-JAX conv reference
    w1, b1, w2, b2 = params
    x_bch = jnp.transpose(x, (0, 3, 1, 2)).reshape(2, C_IN, H_IN)
    ref = _ref_embed(x_bch, w1, b1, w2, b2)                          # (B, 25, 243)
    got = embed_pallas(*_prep_embed_inputs(x_bch, w1, b1, w2, b2))
    got = jnp.transpose(got[:, :L2, :C2], (0, 2, 1))                 # (B, 25, 243)
    err = float(jnp.max(jnp.abs(got - ref)))
    assert jnp.allclose(got, ref, atol=2e-3, rtol=2e-3), err

    print("KERNEL_OK")
</pallas_src>

<mosaic_0001>
module attributes {stable_mosaic.version = 11 : i64} {
  func.func @kernel(%arg0: i32, %arg1: memref<1x256x16xbf16, #tpu.memory_space<vmem>>, %arg2: memref<16x16xbf16, #tpu.memory_space<vmem>>, %arg3: memref<1x16xf32, #tpu.memory_space<vmem>>, %arg4: memref<64x128xbf16, #tpu.memory_space<vmem>>, %arg5: memref<1x128xf32, #tpu.memory_space<vmem>>, %arg6: memref<1x248x128xf32, #tpu.memory_space<vmem>>) attributes {dimension_semantics = [#tpu.dimension_semantics<parallel>], iteration_bounds = array<i64: 2>, scalar_prefetch = 0 : i64, scratch_operands = 0 : i64, tpu.core_type = #tpu.core_type<tc>, window_params = [{transform_indices = @transform_0, window_bounds = array<i64: 1, 256, 16>}, {pipeline_mode = #tpu.pipeline_mode<synchronous>, transform_indices = @transform_1, window_bounds = array<i64: 16, 16>}, {pipeline_mode = #tpu.pipeline_mode<synchronous>, transform_indices = @transform_2, window_bounds = array<i64: 1, 16>}, {pipeline_mode = #tpu.pipeline_mode<synchronous>, transform_indices = @transform_3, window_bounds = array<i64: 64, 128>}, {pipeline_mode = #tpu.pipeline_mode<synchronous>, transform_indices = @transform_4, window_bounds = array<i64: 1, 128>}, {transform_indices = @transform_5, window_bounds = array<i64: 1, 248, 128>}]} {
    %c0 = arith.constant 0 : index
    %c0_0 = arith.constant 0 : index
    %0 = vector.load %arg2[%c0, %c0_0] : memref<16x16xbf16, #tpu.memory_space<vmem>>, vector<16x16xbf16>
    %c0_1 = arith.constant 0 : index
    %c0_2 = arith.constant 0 : index
    %1 = vector.load %arg4[%c0_1, %c0_2] : memref<64x128xbf16, #tpu.memory_space<vmem>>, vector<64x128xbf16>
    %c0_3 = arith.constant 0 : index
    %c0_4 = arith.constant 0 : index
    %2 = vector.load %arg3[%c0_3, %c0_4] : memref<1x16xf32, #tpu.memory_space<vmem>>, vector<1x16xf32>
    %c0_5 = arith.constant 0 : index
    %c0_6 = arith.constant 0 : index
    %3 = vector.load %arg5[%c0_5, %c0_6] : memref<1x128xf32, #tpu.memory_space<vmem>>, vector<1x128xf32>
    %c0_7 = arith.constant 0 : index
    %c0_8 = arith.constant 0 : index
    %c0_9 = arith.constant 0 : index
    %4 = vector.load %arg1[%c0_7, %c0_8, %c0_9] : memref<1x256x16xbf16, #tpu.memory_space<vmem>>, vector<1x256x16xbf16>
    %5 = vector.shape_cast %4 : vector<1x256x16xbf16> to vector<256x16xbf16>
    %cst = arith.constant dense<0.000000e+00> : vector<256x16xf32>
    %6 = tpu.matmul %5, %0, %cst {dimension_numbers = #tpu.dot_dimension_numbers<[1], [0], [0], [1], [0, 0, 1, 1], [], []>} : vector<256x16xbf16>, vector<16x16xbf16>, vector<256x16xf32> -> vector<256x16xf32>
    %7 = vector.broadcast %2 : vector<1x16xf32> to vector<256x16xf32>
    %8 = arith.addf %6, %7 : vector<256x16xf32>
    %cst_10 = arith.constant 0.000000e+00 : f32
    %9 = vector.broadcast %cst_10 : f32 to vector<256x16xf32>
    %10 = arith.maximumf %8, %9 : vector<256x16xf32>
    %11 = vector.extract_strided_slice %10 {offsets = [0, 0], sizes = [248, 16], strides = [1, 1]} : vector<256x16xf32> to vector<248x16xf32>
    %12 = vector.extract_strided_slice %10 {offsets = [1, 0], sizes = [248, 16], strides = [1, 1]} : vector<256x16xf32> to vector<248x16xf32>
    %13 = vector.extract_strided_slice %10 {offsets = [2, 0], sizes = [248, 16], strides = [1, 1]} : vector<256x16xf32> to vector<248x16xf32>
    %14 = vector.extract_strided_slice %10 {offsets = [3, 0], sizes = [248, 16], strides = [1, 1]} : vector<256x16xf32> to vector<248x16xf32>
    %15 = tpu.concatenate %11, %12, %13, %14 in 1 : vector<248x16xf32>, vector<248x16xf32>, vector<248x16xf32>, vector<248x16xf32> -> vector<248x64xf32>
    %16 = arith.truncf %15 : vector<248x64xf32> to vector<248x64xbf16>
    %cst_11 = arith.constant dense<0.000000e+00> : vector<248x128xf32>
    %17 = tpu.matmul %16, %1, %cst_11 {dimension_numbers = #tpu.dot_dimension_numbers<[1], [0], [0], [1], [0, 0, 1, 1], [], []>} : vector<248x64xbf16>, vector<64x128xbf16>, vector<248x128xf32> -> vector<248x128xf32>
    %18 = vector.broadcast %3 : vector<1x128xf32> to vector<248x128xf32>
    %19 = arith.addf %17, %18 : vector<248x128xf32>
    %c0_12 = arith.constant 0 : index
    %c0_13 = arith.constant 0 : index
    %c0_14 = arith.constant 0 : index
    %20 = vector.load %arg6[%c0_12, %c0_13, %c0_14] : memref<1x248x128xf32, #tpu.memory_space<vmem>>, vector<1x248x128xf32>
    %21 = vector.shape_cast %20 : vector<1x248x128xf32> to vector<248x128xf32>
    %22 = vector.shape_cast %19 : vector<248x128xf32> to vector<1x248x128xf32>
    tpu.vector_store %arg6[%c0_12, %c0_13, %c0_14], %22 {strides = array<i32>} : memref<1x248x128xf32, #tpu.memory_space<vmem>>, vector<1x248x128xf32>,
    return
  }
  func.func @transform_0(%arg0: i32) -> (i32, i32, i32) {
    %c0_i32 = arith.constant 0 : i32
    %c0_i32_0 = arith.constant 0 : i32
    %c0_i32_1 = arith.constant 0 : i32
    return %arg0, %c0_i32, %c0_i32_0 : i32, i32, i32
  }
  func.func @transform_1(%arg0: i32) -> (i32, i32) {
    %c0_i32 = arith.constant 0 : i32
    %c0_i32_0 = arith.constant 0 : i32
    %c0_i32_1 = arith.constant 0 : i32
    return %c0_i32, %c0_i32_0 : i32, i32
  }
  func.func @transform_2(%arg0: i32) -> (i32, i32) {
    %c0_i32 = arith.constant 0 : i32
    %c0_i32_0 = arith.constant 0 : i32
    %c0_i32_1 = arith.constant 0 : i32
    return %c0_i32, %c0_i32_0 : i32, i32
  }
  func.func @transform_3(%arg0: i32) -> (i32, i32) {
    %c0_i32 = arith.constant 0 : i32
    %c0_i32_0 = arith.constant 0 : i32
    %c0_i32_1 = arith.constant 0 : i32
    return %c0_i32, %c0_i32_0 : i32, i32
  }
  func.func @transform_4(%arg0: i32) -> (i32, i32) {
    %c0_i32 = arith.constant 0 : i32
    %c0_i32_0 = arith.constant 0 : i32
    %c0_i32_1 = arith.constant 0 : i32
    return %c0_i32, %c0_i32_0 : i32, i32
  }
  func.func @transform_5(%arg0: i32) -> (i32, i32, i32) {
    %c0_i32 = arith.constant 0 : i32
    %c0_i32_0 = arith.constant 0 : i32
    %c0_i32_1 = arith.constant 0 : i32
    return %arg0, %c0_i32, %c0_i32_0 : i32, i32, i32
  }
}

</mosaic_0001>

<bundles_post_ra>
// kernel: tpu_custom_call.1
= control target key start
LH: loop header
LB: loop body
LE: loop exit
PB: predicated region body
PF: predicated region fallthrough
CT: control target
= control target key end

     0   :  { %10 = vsyncpa [#allocation3], 0  ;;  %s2648_s0 = inlined_call_operand.vmem [shape: bf16[2,256,16], index: 0, kind: input, shape index: {}]   ;;  %s2649_s1 = inlined_call_operand.vmem [shape: bf16[16,16], index: 1, kind: input, shape index: {}]   ;;  %s2650_s2 = inlined_call_operand.vmem [shape: f32[1,16], index: 2, kind: input, shape index: {}]   ;;  %s2651_s3 = inlined_call_operand.vmem [shape: bf16[64,128], index: 3, kind: input, shape index: {}]   ;;  %s2652_s4 = inlined_call_operand.vmem [shape: f32[1,128], index: 4, kind: input, shape index: {}]   ;;  %s2653_s5 = inlined_call_operand.hbm [shape: f32[2,248,128], index: 5, kind: output, shape index: {}]  }
   0x1   :  { %12 = vsyncpa [#allocation3 + $0x1], 0  ;;  %s1938_s18 = smov 0   ;;  %s1940_s19 = smov 0  }
   0x2   :  { %s1942_s20 = smov 0   ;;  %s1944_s21 = smov 0  }
   0x3 LB: > { %s1959_s22 = sadd.s32 4294967295, %s1901_s21   ;;  %s1414_s23 = sadd.s32 4294967294, %s1901_s21   ;;  %s1901_s21 = sphi %s1944_s21, %s2659_s21   ;;  %s1897_s20 = sphi %s1942_s20, %s2658_s20   ;;  %s1893_s19 = sphi %s1940_s19, %s2657_s19   ;;  %s1889_s18 = sphi %s1938_s18, %s2656_s18  }
   0x4   : > { %s1963_s24 = sadd.s32 1, %s1901_s21   ;;  %s135_s25 = sadd.s32 1, %s1897_s20 }
   0x5   : > { %s132_s26 = ssub.s32 %s1901_s21, %s1963_s24  ;;  %p145_p0 = scmp.ne.s32.totalorder %s1897_s20, %s1893_s19 }
   0x6   : > { %p133_p1 = scmp.eq.s32.totalorder %s132_s26, 0  ;;  %p146_p2 = scmp.eq.s32.totalorder %s1959_s22, 1 }
   0x7   : > { %p151_p3 = scmp.ne.s32.totalorder %s1893_s19, %s1889_s18  ;;  %p152_p4 = scmp.eq.s32.totalorder %s1414_s23, 1 }
   0x8   : > { %s1974_s27 = scalar_select %p133_p1, %s1897_s20, %s135_s25  }
   0x9   : > { %p1976_p5 = por %p146_p2, %p145_p0  ;;  %p1980_p6 = por %p152_p4, %p151_p3 }
   0xa   : > { %p1417_p7 = scmp.ge.s32.totalorder %s1901_s21, 1  ;;  %p190_p8 = scmp.lt.s32.totalorder %s1901_s21, 3 }
   0xc   : > { %p191_p9 = pnand %p1417_p7, %p190_p8 }
   0xd   : > { %p218_p10 = scmp.lt.s32.totalorder (!%p191_p9), %s1959_s22, 1  ;;  %s1903_s14 = smov (!%p191_p9), 32  }
   0xe   : > { %194 = sbr.rel (%p191_p9) target bundleno = 677 (0x2a5), region = 40  ;;  %s1904_s15 = smov (!%p191_p9), 16  }
   0xf   : > { %s1905_s16 = smov (!%p191_p9), 48   ;;  %s215_s9 = sand.u32 (!%p191_p9), 1, %s1893_s19  }
  0x10   : > { %s1566_s10 = smul.u32 (!%p191_p9), 248, %s215_s9 }
  0x12   : > { %s2427_s13 = scalar_lea.vmem (!%p191_p9), [#allocation2], %s1566_s10 }
  0x13   : > { %v1540_v0 = vld [vmem:[%s2649_s1] sm:$0xff]  ;;  %s219_s7 = scalar_select %p218_p10, %s1959_s22, 1  ;;  %vm357_vm0 = vcmask 130048   ;;  %vm716_vm1 = vcmask 1045504   ;;  %vm559_vm2 = vcmask 1046528   ;;  %vm873_vm3 = vcmask 1044480  }
  0x14   : > { %413 = vmatpush.bf16.msra.mxu0 %v1540_v0  ;;  %1561 = vmatpush.bf16.msra.mxu3 %v1540_v0  ;;  %v2031_v19 = vld [vmem:[%s2650_s2] ss:$0 sm:$0xff]  ;;  %vm1061_vm4 = vcmask 261120   ;;  %vm1093_vm5 = vcmask 392192   ;;  %vm1168_vm6 = vcmask 523264   ;;  %s1349_s23 = sshll.u32 %s2427_s13, 4  ;;  %s1350_s23 = int_to_ptr.vmem [resolvable:$true] %s1349_s23 }
  0x15   : > { %s1539_s8 = sshll.u32 %s219_s7, 7 }
  0x16   : > { %s1994_s11 = scalar_lea.vmem %s2648_s0, %s1539_s8  ;;  %s1859_s8 = scalar_lea.hbm %s2653_s5, 496 }
  0x17   : > { %v1545_v1 = vld [vmem:[%s1994_s11] sm:$0xff]  ;;  %v1554_v2 = vld [vmem:[%s1994_s11 + $0x48] sm:$0xff]  ;;  %v1555_v4 = vld [vmem:[%s1994_s11 + $0x50] sm:$0xff] }
  0x18   : > { %1488 = vmatmul.msk.bf16.vlgmr.msra.gmra.mxu0 %vm357_vm0, %v1545_v1  ;;  %1497 = vmatmul.msk.bf16.vlgmr.msra.gmra.mxu3 %vm357_vm0, %v1554_v2  ;;  %v1546_v3 = vld [vmem:[%s1994_s11 + $0x8] sm:$0xff]  ;;  %v1547_v5 = vld [vmem:[%s1994_s11 + $0x10] sm:$0xff]  ;;  %v1556_v6 = vld [vmem:[%s1994_s11 + $0x58] sm:$0xff] }
  0x19   : > { %v1548_v7 = vld [vmem:[%s1994_s11 + $0x18] sm:$0xff]  ;;  %v1557_v8 = vld [vmem:[%s1994_s11 + $0x60] sm:$0xff]  ;;  %v1558_v10 = vld [vmem:[%s1994_s11 + $0x68] sm:$0xff] }
  0x1a   : > { %v1549_v9 = vld [vmem:[%s1994_s11 + $0x20] sm:$0xff]  ;;  %v1550_v11 = vld [vmem:[%s1994_s11 + $0x28] sm:$0xff]  ;;  %v1559_v12 = vld [vmem:[%s1994_s11 + $0x70] sm:$0xff] }
  0x1b   : > { %v1551_v13 = vld [vmem:[%s1994_s11 + $0x30] sm:$0xff]  ;;  %v1560_v14 = vld [vmem:[%s1994_s11 + $0x78] sm:$0xff]  ;;  %v1553_v16 = vld [vmem:[%s1994_s11 + $0x40] sm:$0xff] }
  0x1c   : > { %v1552_v15 = vld [vmem:[%s1994_s11 + $0x38] sm:$0xff] }
  0x28   : > { %1489 = vmatmul.msk.bf16.gmra.mxu0 %vm357_vm0, %v1546_v3  ;;  %1498 = vmatmul.msk.bf16.gmra.mxu3 %vm357_vm0, %v1555_v4 }
  0x38   : > { %1490 = vmatmul.msk.bf16.gmra.mxu0 %vm357_vm0, %v1547_v5  ;;  %1499 = vmatmul.msk.bf16.gmra.mxu3 %vm357_vm0, %v1556_v6 }
  0x48   : > { %1491 = vmatmul.msk.bf16.gmra.mxu0 %vm357_vm0, %v1548_v7  ;;  %1500 = vmatmul.msk.bf16.gmra.mxu3 %vm357_vm0, %v1557_v8 }
  0x58   : > { %1492 = vmatmul.msk.bf16.gmra.mxu0 %vm357_vm0, %v1549_v9  ;;  %1501 = vmatmul.msk.bf16.gmra.mxu3 %vm357_vm0, %v1558_v10 }
  0x68   : > { %1493 = vmatmul.msk.bf16.gmra.mxu0 %vm357_vm0, %v1550_v11  ;;  %1502 = vmatmul.msk.bf16.gmra.mxu3 %vm357_vm0, %v1559_v12 }
  0x78   : > { %1494 = vmatmul.msk.bf16.gmra.mxu0 %vm357_vm0, %v1551_v13  ;;  %1503 = vmatmul.msk.bf16.gmra.mxu3 %vm357_vm0, %v1560_v14 }
  0x88   : > { %1495 = vmatmul.msk.bf16.gmra.mxu0 %vm357_vm0, %v1552_v15 }
  0x95   : > { %v415_v17 = vpop.f32.mrf.mxu0 }
  0x96   : > { %v416_v21 = vadd.f32 %v2031_v19, %v415_v17 }
  0x98   : > { %1496 = vmatmul.msk.bf16.gmra.mxu0 %vm357_vm0, %v1553_v16  ;;  %v2037_v24 = vmax.f32 %v416_v21, 0.0 }
  0x9a   : > { %v717_v29 = vrot.slane %v2037_v24, 2  ;;  %v560_v31 = vrot.slane %v2037_v24, 1  ;;  %v874_v43 = vrot.slane %v2037_v24, 3 }
  0x9d   : > { %v417_v18 = vpop.f32.mrf.mxu0 }
  0x9e   : > { %v418_v20 = vadd.f32 %v2031_v19, %v417_v18 }
  0xa0   : > { %v2035_v22 = vmax.f32 %v418_v20, 0.0 }
  0xa2   : > { %v718_v27 = vrot.slane %v2035_v22, 2  ;;  %v561_v28 = vrot.slane %v2035_v22, 1  ;;  %v875_v41 = vrot.slane %v2035_v22, 3 }
  0xa4   : > { %v719_v33 = vsel %vm716_vm1, %v717_v29, %v718_v27  ;;  %v562_v35 = vsel %vm559_vm2, %v560_v31, %v561_v28  ;;  %v876_v46 = vsel %vm873_vm3, %v874_v43, %v875_v41 }
  0xa5   : > { %v420_v23 = vpop.f32.mrf.mxu0 }
  0xa6   : > { %v421_v25 = vadd.f32 %v2031_v19, %v420_v23 }
  0xa8   : > { %v2040_v26 = vmax.f32 %v421_v25, 0.0 }
  0xaa   : > { %v720_v30 = vrot.slane %v2040_v26, 2  ;;  %v563_v32 = vrot.slane %v2040_v26, 1  ;;  %v877_v40 = vrot.slane %v2040_v26, 3 }
  0xac   : > { %v721_v34 = vsel %vm716_vm1, %v718_v27, %v720_v30  ;;  %v564_v36 = vsel %vm559_vm2, %v561_v28, %v563_v32  ;;  %v878_v44 = vsel %vm873_vm3, %v875_v41, %v877_v40 }
  0xad   : > { %v422_v37 = vpop.f32.mrf.mxu0  ;;  %v1632_v38 = vpack.i.bf16 %v721_v34, %v719_v33  ;;  %v1622_v39 = vpack.i.bf16 %v564_v36, %v562_v35  ;;  %v1637_v48 = vpack.i.bf16 %v878_v44, %v876_v46 }
  0xae   : > { %v423_v42 = vadd.f32 %v2031_v19, %v422_v37 }
  0xaf   : > { %1633 = vrot.lane.b32.xlu2 %v1632_v38, %s1903_s14  ;;  %1623 = vrot.lane.b32.xlu1 %v1622_v39, %s1904_s15 }
  0xb0   : > { %v2061_v45 = vmax.f32 %v423_v42, 0.0 }
  0xb2   : > { %v565_v50 = vrot.slane %v2061_v45, 1  ;;  %v879_v58 = vrot.slane %v2061_v45, 3 }
  0xb4   : > { %v566_v53 = vsel %vm559_vm2, %v563_v32, %v565_v50  ;;  %v880_v62 = vsel %vm873_vm3, %v877_v40, %v879_v58 }
  0xb5   : > { %v425_v47 = vpop.f32.mrf.mxu0 }
  0xb6   : > { %v426_v49 = vadd.f32 %v2031_v19, %v425_v47 }
  0xb7   : > { %1638 = vrot.lane.b32.xlu2 %v1637_v48, %s1905_s16 }
  0xb8   : > { %v2067_v51 = vmax.f32 %v426_v49, 0.0 }
  0xba   : > { %v567_v52 = vrot.slane %v2067_v51, 1  ;;  %v881_v57 = vrot.slane %v2067_v51, 3 }
  0xbc   : > { %v568_v54 = vsel %vm559_vm2, %v565_v50, %v567_v52  ;;  %v882_v60 = vsel %vm873_vm3, %v879_v58, %v881_v57 }
  0xbd   : > { %v427_v55 = vpop.f32.mrf.mxu0  ;;  %v1652_v56 = vpack.i.bf16 %v568_v54, %v566_v53  ;;  %v1667_v0 = vpack.i.bf16 %v882_v60, %v880_v62  ;;  %v1544_v60 = vld [vmem:[%s2651_s3 + $0x18] sm:$0xff] }
  0xbe   : > { %v428_v59 = vadd.f32 %v2031_v19, %v427_v55  ;;  %1221 = vmatpush.bf16.msra.mxu1 %v1544_v60  ;;  %1562 = vmatpush.bf16.msra.mxu2 %v1544_v60 }
  0xbf   : > { %1653 = vrot.lane.b32.xlu2 %v1652_v56, %s1904_s15 }
  0xc0   : > { %v2077_v61 = vmax.f32 %v428_v59, 0.0 }
  0xc2   : > { %v569_v2 = vrot.slane %v2077_v61, 1  ;;  %v883_v10 = vrot.slane %v2077_v61, 3 }
  0xc4   : > { %v570_v5 = vsel %vm559_vm2, %v567_v52, %v569_v2  ;;  %v884_v14 = vsel %vm873_vm3, %v881_v57, %v883_v10  ;;  %v460_v57 = vpop.f32.mrf.mxu3 }
  0xc5   : > { %v430_v63 = vpop.f32.mrf.mxu0 }
  0xc6   : > { %v431_v1 = vadd.f32 %v2031_v19, %v430_v63 }
  0xc7   : > { %1668 = vrot.lane.b32.xlu2 %v1667_v0, %s1905_s16 }
  0xc8   : > { %v2083_v3 = vmax.f32 %v431_v1, 0.0 }
  0xca   : > { %v571_v4 = vrot.slane %v2083_v3, 1  ;;  %v885_v9 = vrot.slane %v2083_v3, 3 }
  0xcc   : > { %v572_v6 = vsel %vm559_vm2, %v569_v2, %v571_v4  ;;  %v886_v12 = vsel %vm873_vm3, %v883_v10, %v885_v9 }
  0xcd   : > { %v432_v7 = vpop.f32.mrf.mxu0  ;;  %v1682_v8 = vpack.i.bf16 %v572_v6, %v570_v5  ;;  %v1697_v16 = vpack.i.bf16 %v886_v12, %v884_v14 }
  0xce   : > { %v433_v11 = vadd.f32 %v2031_v19, %v432_v7 }
  0xcf   : > { %1683 = vrot.lane.b32.xlu2 %v1682_v8, %s1904_s15  ;;  %v1542_v8 = vld [vmem:[%s2651_s3 + $0x8] sm:$0xff] }
  0xd0   : > { %v2093_v13 = vmax.f32 %v433_v11, 0.0 }
  0xd2   : > { %v573_v18 = vrot.slane %v2093_v13, 1  ;;  %v887_v31 = vrot.slane %v2093_v13, 3 }
  0xd4   : > { %v574_v23 = vsel %vm559_vm2, %v571_v4, %v573_v18  ;;  %v888_v35 = vsel %vm873_vm3, %v885_v9, %v887_v31  ;;  %v1543_v4 = vld [vmem:[%s2651_s3 + $0x10] sm:$0xff]  ;;  %v462_v9 = vpop.f32.mrf.mxu3 }
  0xd5   : > { %v435_v15 = vpop.f32.mrf.mxu0  ;;  %1222 = vmatpush.bf16.msra.mxu1 %v1543_v4  ;;  %1563 = vmatpush.bf16.msra.mxu2 %v1543_v4 }
  0xd6   : > { %v436_v17 = vadd.f32 %v2031_v19, %v435_v15 }
  0xd7   : > { %1698 = vrot.lane.b32.xlu2 %v1697_v16, %s1905_s16  ;;  %v1541_v16 = vld [vmem:[%s2651_s3] sm:$0xff] }
  0xd8   : > { %v2099_v20 = vmax.f32 %v436_v17, 0.0 }
  0xd9   : > { %1223 = vmatpush.bf16.msra.mxu1 %v1542_v8  ;;  %1564 = vmatpush.bf16.msra.mxu2 %v1542_v8 }
  0xda   : > { %v575_v21 = vrot.slane %v2099_v20, 1  ;;  %v889_v29 = vrot.slane %v2099_v20, 3 }
  0xdc   : > { %v576_v25 = vsel %vm559_vm2, %v573_v18, %v575_v21  ;;  %v890_v33 = vsel %vm873_vm3, %v887_v31, %v889_v29 }
  0xdd   : > { %v437_v27 = vpop.f32.mrf.mxu0  ;;  %v1712_v28 = vpack.i.bf16 %v576_v25, %v574_v23  ;;  %v1727_v37 = vpack.i.bf16 %v890_v33, %v888_v35  ;;  %1224 = vmatpush.bf16.msra.mxu1 %v1541_v16  ;;  %1565 = vmatpush.bf16.msra.mxu2 %v1541_v16  ;;  %v465_v25 = vpop.f32.mrf.mxu3 }
  0xde   : > { %v438_v32 = vadd.f32 %v2031_v19, %v437_v27 }
  0xdf   : > { %1713 = vrot.lane.b32.xlu2 %v1712_v28, %s1904_s15 }
  0xe0   : > { %v2109_v34 = vmax.f32 %v438_v32, 0.0 }
  0xe2   : > { %v577_v39 = vrot.slane %v2109_v34, 1  ;;  %v891_v48 = vrot.slane %v2109_v34, 3 }
  0xe4   : > { %v578_v42 = vsel %vm559_vm2, %v575_v21, %v577_v39  ;;  %v892_v53 = vsel %vm873_vm3, %v889_v29, %v891_v48 }
  0xe5   : > { %v440_v36 = vpop.f32.mrf.mxu0 }
  0xe6   : > { %v441_v38 = vadd.f32 %v2031_v19, %v440_v36 }
  0xe7   : > { %1728 = vrot.lane.b32.xlu2 %v1727_v37, %s1905_s16 }
  0xe8   : > { %v2115_v40 = vmax.f32 %v441_v38, 0.0 }
  0xea   : > { %v579_v41 = vrot.slane %v2115_v40, 1  ;;  %v893_v47 = vrot.slane %v2115_v40, 3 }
  0xec   : > { %v580_v43 = vsel %vm559_vm2, %v577_v39, %v579_v41  ;;  %v894_v50 = vsel %vm873_vm3, %v891_v48, %v893_v47 }
  0xed   : > { %v442_v44 = vpop.f32.mrf.mxu0  ;;  %v1742_v46 = vpack.i.bf16 %v580_v43, %v578_v42  ;;  %v1757_v55 = vpack.i.bf16 %v894_v50, %v892_v53  ;;  %v461_v50 = vadd.f32 %v2031_v19, %v460_v57 }
  0xee   : > { %v443_v49 = vadd.f32 %v2031_v19, %v442_v44 }
  0xef   : > { %1743 = vrot.lane.b32.xlu2 %v1742_v46, %s1904_s15 }
  0xf0   : > { %v2125_v52 = vmax.f32 %v443_v49, 0.0 }
  0xf2   : > { %v581_v58 = vrot.slane %v2125_v52, 1  ;;  %v895_v6 = vrot.slane %v2125_v52, 3 }
  0xf4   : > { %v582_v63 = vsel %vm559_vm2, %v579_v41, %v581_v58  ;;  %v896_v12 = vsel %vm873_vm3, %v893_v47, %v895_v6  ;;  %v2180_v47 = vpop.f32.mrf.mxu3 }
  0xf5   : > { %v445_v54 = vpop.f32.mrf.mxu0 }
  0xf6   : > { %v446_v56 = vadd.f32 %v2031_v19, %v445_v54  ;;  %v463_v54 = vadd.f32 %v2031_v19, %v462_v9 }
  0xf7   : > { %1758 = vrot.lane.b32.xlu2 %v1757_v55, %s1905_s16  ;;  %v466_v55 = vadd.f32 %v2031_v19, %v465_v25 }
  0xf8   : > { %v2131_v59 = vmax.f32 %v446_v56, 0.0  ;;  %v2192_v60 = vmax.f32 %v463_v54, 0.0 }
  0xfa   : > { %v583_v62 = vrot.slane %v2131_v59, 1  ;;  %v897_v5 = vrot.slane %v2131_v59, 3  ;;  %v754_v8 = vrot.slane %v2192_v60, 2 }
  0xfc   : > { %v584_v0 = vsel %vm559_vm2, %v581_v58, %v583_v62  ;;  %v898_v10 = vsel %vm873_vm3, %v895_v6, %v897_v5  ;;  %v2190_v58 = vmax.f32 %v461_v50, 0.0  ;;  %v470_v4 = vpop.f32.mrf.mxu3 }
  0xfd   : > { %v447_v1 = vpop.f32.mrf.mxu0  ;;  %v1772_v2 = vpack.i.bf16 %v584_v0, %v582_v63  ;;  %v1787_v15 = vpack.i.bf16 %v898_v10, %v896_v12 }
  0xfe   : > { %v448_v7 = vadd.f32 %v2031_v19, %v447_v1  ;;  %v752_v57 = vrot.slane %v2190_v58, 2  ;;  %v595_v12 = vrot.slane %v2190_v58, 1 }
  0xff   : > { %1773 = vrot.lane.b32.xlu2 %v1772_v2, %s1904_s15  ;;  %v909_v2 = vrot.slane %v2190_v58, 3 }
 0x100   : > { %v2150_v11 = vmax.f32 %v448_v7, 0.0 }
 0x102   : > { %v585_v18 = vrot.slane %v2150_v11, 1  ;;  %v899_v35 = vrot.slane %v2150_v11, 3 }
 0x104   : > { %v586_v27 = vsel %vm559_vm2, %v583_v62, %v585_v18  ;;  %v900_v41 = vsel %vm873_vm3, %v897_v5, %v899_v35  ;;  %v2194_v62 = vmax.f32 %v466_v55, 0.0  ;;  %v472_v50 = vpop.f32.mrf.mxu3 }
 0x105   : > { %v450_v14 = vpop.f32.mrf.mxu0 }
 0x106   : > { %v451_v17 = vadd.f32 %v2031_v19, %v450_v14  ;;  %v756_v9 = vrot.slane %v2194_v62, 2 }
 0x107   : > { %1788 = vrot.lane.b32.xlu2 %v1787_v15, %s1905_s16 }
 0x108   : > { %v2159_v21 = vmax.f32 %v451_v17, 0.0 }
 0x109   : > { %v1634_v48 = vpop.permute.xlu2 %1633 }
 0x10a   : > { %v587_v23 = vrot.slane %v2159_v21, 1  ;;  %v901_v32 = vrot.slane %v2159_v21, 3  ;;  %v1636_v14 = vunpack.i.h.bf16 %v1634_v48  ;;  %v1635_v15 = vunpack.i.l.bf16 %v1634_v48 }
 0x10c   : > { %v588_v28 = vsel %vm559_vm2, %v585_v18, %v587_v23  ;;  %v902_v37 = vsel %vm873_vm3, %v899_v35, %v901_v32 }
 0x10d   : > { %v452_v29 = vpop.f32.mrf.mxu0  ;;  %v1802_v31 = vpack.i.bf16 %v588_v28, %v586_v27  ;;  %v1817_v44 = vpack.i.bf16 %v902_v37, %v900_v41 }
 0x10e   : > { %v453_v33 = vadd.f32 %v2031_v19, %v452_v29 }
 0x10f   : > { %1803 = vrot.lane.b32.xlu2 %v1802_v31, %s1904_s15 }
 0x110   : > { %v2168_v36 = vmax.f32 %v453_v33, 0.0 }
 0x111   : > { %v1639_v5 = vpop.permute.xlu2 %1638 }
 0x112   : > { %v589_v38 = vrot.slane %v2168_v36, 1  ;;  %v903_v39 = vrot.slane %v2168_v36, 3  ;;  %v1641_v17 = vunpack.i.h.bf16 %v1639_v5  ;;  %v1640_v27 = vunpack.i.l.bf16 %v1639_v5 }
 0x114   : > { %v2175_v42 = vsel %vm559_vm2, %v587_v23, %v589_v38  ;;  %v2178_v46 = vsel %vm873_vm3, %v901_v32, %v903_v39 }
 0x115   : > { %v455_v43 = vpop.f32.mrf.mxu0 }
 0x116   : > { %v456_v49 = vadd.f32 %v2031_v19, %v455_v43 }
 0x117   : > { %1818 = vrot.lane.b32.xlu2 %v1817_v44, %s1905_s16 }
 0x118   : > { %v2185_v53 = vmax.f32 %v456_v49, 0.0 }
 0x11a   : > { %v591_v56 = vrot.slane %v2185_v53, 1  ;;  %v905_v7 = vrot.slane %v2185_v53, 3  ;;  %v748_v49 = vrot.slane %v2185_v53, 2 }
 0x11c   : > { %v592_v1 = vsel %vm559_vm2, %v589_v38, %v591_v56  ;;  %v906_v28 = vsel %vm873_vm3, %v903_v39, %v905_v7 }
 0x11d   : > { %v457_v63 = vpop.f32.mrf.mxu0 }
 0x11e   : > { %v458_v0 = vadd.f32 %v2031_v19, %v457_v63  ;;  %v757_v63 = vsel %vm716_vm1, %v754_v8, %v756_v9 }
 0x11f   : > { %653 = vrot.lane.b32.xlu2 %v592_v1, %s1904_s15 }
 0x120   : > { %v2201_v6 = vmax.f32 %v458_v0, 0.0  ;;  %v468_v0 = vadd.f32 %v2031_v19, %v2180_v47 }
 0x121   : > { %v1624_v10 = vpop.permute.xlu1 %1623 }
 0x122   : > { %v907_v16 = vrot.slane %v2201_v6, 3  ;;  %v1626_v18 = vunpack.i.h.bf16 %v1624_v10  ;;  %v1625_v23 = vunpack.i.l.bf16 %v1624_v10  ;;  %v593_v25 = vrot.slane %v2201_v6, 1 }
 0x123   : > { %v750_v44 = vrot.slane %v2201_v6, 2  ;;  %v724_v10 = vrot.slane %v2067_v51, 2 }
 0x124   : > { %v908_v29 = vsel %vm873_vm3, %v905_v7, %v907_v16  ;;  %v910_v31 = vsel %vm873_vm3, %v907_v16, %v909_v2  ;;  %v1031_v32 = vsel %vm357_vm0, %v2035_v22, %v1626_v18  ;;  %v1030_v33 = vsel %vm357_vm0, %v2037_v24, %v1625_v23  ;;  %v475_v23 = vpop.f32.mrf.mxu3 }
 0x125   : > { %v594_v35 = vsel %vm559_vm2, %v591_v56, %v593_v25  ;;  %v596_v37 = vsel %vm559_vm2, %v593_v25, %v595_v12  ;;  %v1627_v41 = vpack.i.bf16 %v910_v31, %v908_v29  ;;  %v1062_v39 = vsel %vm1061_vm4, %v1030_v33, %v1635_v15 }
 0x126   : > { %v1612_v38 = vpack.i.bf16 %v596_v37, %v594_v35  ;;  %v1063_v43 = vsel %vm1061_vm4, %v1031_v32, %v1636_v14  ;;  %v1094_v48 = vsel %vm1093_vm5, %v1062_v39, %v1640_v27  ;;  %v751_v54 = vsel %vm716_vm1, %v748_v49, %v750_v44 }
 0x127   : > { %967 = vrot.lane.b32.xlu2 %v906_v28, %s1905_s16  ;;  %v1095_v22 = vsel %vm1093_vm5, %v1063_v43, %v1641_v17  ;;  %1628 = vrot.lane.b32.xlu1 %v1627_v41, %s1905_s16  ;;  %v753_v55 = vsel %vm716_vm1, %v750_v44, %v752_v57  ;;  %v755_v56 = vsel %vm716_vm1, %v752_v57, %v754_v8  ;;  %v597_v7 = vrot.slane %v2192_v60, 1 }
 0x128   : > { %1613 = vrot.lane.b32.xlu0 %v1612_v38, %s1904_s15  ;;  %v1125_v24 = vpack.c.bf16 %v1095_v22, %v1094_v48  ;;  %v1617_v1 = vpack.i.bf16 %v753_v55, %v751_v54  ;;  %v1647_v5 = vpack.i.bf16 %v757_v63, %v755_v56  ;;  %v599_v14 = vrot.slane %v2194_v62, 1 }
 0x129   : > { %v471_v15 = vadd.f32 %v2031_v19, %v470_v4  ;;  %v722_v57 = vrot.slane %v2061_v45, 2  ;;  %v2247_v8 = vmax.f32 %v468_v0, 0.0  ;;  %v598_v47 = vsel %vm559_vm2, %v595_v12, %v597_v7 }
 0x12a   : > { %1520 = vmatmul.msk.bf16.vlgmr.msra.gmra.mxu1 %vm1168_vm6, %v1125_v24  ;;  %v600_v17 = vsel %vm559_vm2, %v597_v7, %v599_v14  ;;  %v911_v28 = vrot.slane %v2192_v60, 3  ;;  %v913_v29 = vrot.slane %v2194_v62, 3  ;;  %v473_v37 = vadd.f32 %v2031_v19, %v472_v50 }
 0x12b   : > { %v2249_v16 = vmax.f32 %v471_v15, 0.0  ;;  %v725_v18 = vsel %vm716_vm1, %v722_v57, %v724_v10  ;;  %v723_v4 = vsel %vm716_vm1, %v720_v30, %v722_v57  ;;  %v1642_v25 = vpack.i.bf16 %v600_v17, %v598_v47 }
 0x12c   : > { %v1662_v27 = vpack.i.bf16 %v725_v18, %v723_v4  ;;  %v758_v31 = vrot.slane %v2247_v8, 2  ;;  %v912_v12 = vsel %vm873_vm3, %v909_v2, %v911_v28  ;;  %v914_v30 = vsel %vm873_vm3, %v911_v28, %v913_v29  ;;  %v477_v38 = vpop.f32.mrf.mxu3 }
 0x12d   : > { %v760_v32 = vrot.slane %v2249_v16, 2  ;;  %v1657_v41 = vpack.i.bf16 %v914_v30, %v912_v12  ;;  %v601_v43 = vrot.slane %v2247_v8, 1  ;;  %v728_v44 = vrot.slane %v2083_v3, 2 }
 0x12e   : > { %v759_v33 = vsel %vm716_vm1, %v756_v9, %v758_v31  ;;  %v603_v48 = vrot.slane %v2249_v16, 1  ;;  %v476_v2 = vadd.f32 %v2031_v19, %v475_v23  ;;  %v726_v9 = vrot.slane %v2077_v61, 2 }
 0x12f   : > { %1648 = vrot.lane.b32.xlu1 %v1647_v5, %s1903_s14  ;;  %v761_v35 = vsel %vm716_vm1, %v758_v31, %v760_v32  ;;  %v2279_v22 = vmax.f32 %v473_v37, 0.0  ;;  %v602_v50 = vsel %vm559_vm2, %v599_v14, %v601_v43  ;;  %v917_v5 = vrot.slane %v2249_v16, 3 }
 0x130   : > { %1618 = vrot.lane.b32.xlu0 %v1617_v1, %s1903_s14  ;;  %v1677_v39 = vpack.i.bf16 %v761_v35, %v759_v33  ;;  %v2281_v24 = vmax.f32 %v476_v2, 0.0  ;;  %v604_v54 = vsel %vm559_vm2, %v601_v43, %v603_v48  ;;  %v729_v55 = vsel %vm716_vm1, %v726_v9, %v728_v44 }
 0x131   : > { %v727_v56 = vsel %vm716_vm1, %v724_v10, %v726_v9  ;;  %v1672_v63 = vpack.i.bf16 %v604_v54, %v602_v50  ;;  %v915_v1 = vrot.slane %v2247_v8, 3  ;;  %v762_v7 = vrot.slane %v2279_v22, 2 }
 0x132   : > { %v1692_v0 = vpack.i.bf16 %v729_v55, %v727_v56  ;;  %v764_v15 = vrot.slane %v2281_v24, 2  ;;  %v478_v18 = vadd.f32 %v2031_v19, %v477_v38  ;;  %v607_v28 = vrot.slane %v2281_v24, 1 }
 0x133   : > { %v916_v14 = vsel %vm873_vm3, %v913_v29, %v915_v1  ;;  %v918_v47 = vsel %vm873_vm3, %v915_v1, %v917_v5  ;;  %v763_v10 = vsel %vm716_vm1, %v760_v32, %v762_v7  ;;  %v730_v29 = vrot.slane %v2093_v13, 2 }
 0x134   : > { %v480_v57 = vpop.f32.mrf.mxu3  ;;  %v765_v17 = vsel %vm716_vm1, %v762_v7, %v764_v15  ;;  %v1687_v23 = vpack.i.bf16 %v918_v47, %v916_v14  ;;  %v2305_v32 = vmax.f32 %v478_v18, 0.0  ;;  %v919_v43 = vrot.slane %v2279_v22, 3 }
 0x135   : > { %v1707_v4 = vpack.i.bf16 %v765_v17, %v763_v10  ;;  %v481_v31 = vadd.f32 %v2031_v19, %v480_v57  ;;  %v731_v38 = vsel %vm716_vm1, %v728_v44, %v730_v29  ;;  %v921_v2 = vrot.slane %v2281_v24, 3 }
 0x136   : > { %v766_v9 = vrot.slane %v2305_v32, 2  ;;  %v609_v7 = vrot.slane %v2305_v32, 1  ;;  %v736_v57 = vrot.slane %v2115_v40, 2 }
 0x137   : > { %1663 = vrot.lane.b32.xlu1 %v1662_v27, %s1903_s14  ;;  %v732_v27 = vrot.slane %v2099_v20, 2  ;;  %v2307_v30 = vmax.f32 %v481_v31, 0.0  ;;  %v922_v54 = vsel %vm873_vm3, %v919_v43, %v921_v2 }
 0x138   : > { %1643 = vrot.lane.b32.xlu0 %v1642_v25, %s1904_s15  ;;  %v605_v25 = vrot.slane %v2279_v22, 1  ;;  %v767_v44 = vsel %vm716_vm1, %v764_v15, %v766_v9  ;;  %v610_v17 = vsel %vm559_vm2, %v607_v28, %v609_v7 }
 0x139   : > { %v733_v37 = vsel %vm716_vm1, %v730_v29, %v732_v27  ;;  %v768_v50 = vrot.slane %v2307_v30, 2  ;;  %v611_v14 = vrot.slane %v2307_v30, 1 }
 0x13a   : > { %v606_v33 = vsel %vm559_vm2, %v603_v48, %v605_v25  ;;  %v608_v35 = vsel %vm559_vm2, %v605_v25, %v607_v28  ;;  %v920_v48 = vsel %vm873_vm3, %v917_v5, %v919_v43  ;;  %v734_v5 = vrot.slane %v2109_v34, 2 }
 0x13b   : > { %v769_v55 = vsel %vm716_vm1, %v766_v9, %v768_v50  ;;  %v612_v18 = vsel %vm559_vm2, %v609_v7, %v611_v14 }
 0x13c   : > { %v482_v12 = vpop.f32.mrf.mxu3  ;;  %v1737_v1 = vpack.i.bf16 %v769_v55, %v767_v44  ;;  %v1732_v31 = vpack.i.bf16 %v612_v18, %v610_v17 }
 0x13f   : > { %1678 = vrot.lane.b32.xlu1 %v1677_v39, %s1903_s14  ;;  %v1722_v39 = vpack.i.bf16 %v733_v37, %v731_v38 }
 0x140   : > { %1658 = vrot.lane.b32.xlu0 %v1657_v41, %s1905_s16  ;;  %v1702_v41 = vpack.i.bf16 %v608_v35, %v606_v33  ;;  %v925_v33 = vrot.slane %v2307_v30, 3 }
 0x144   : > { %v485_v56 = vpop.f32.mrf.mxu3 }
 0x145   : > { %v486_v47 = vadd.f32 %v2031_v19, %v485_v56 }
 0x147   : > { %1693 = vrot.lane.b32.xlu1 %v1692_v0, %s1903_s14  ;;  %v1717_v0 = vpack.i.bf16 %v922_v54, %v920_v48  ;;  %v2333_v10 = vmax.f32 %v486_v47, 0.0  ;;  %v740_v48 = vrot.slane %v2131_v59, 2 }
 0x148   : > { %1673 = vrot.lane.b32.xlu0 %v1672_v63, %s1904_s15  ;;  %v483_v63 = vadd.f32 %v2031_v19, %v482_v12  ;;  %v923_v12 = vrot.slane %v2305_v32, 3 }
 0x149   : > { %v772_v37 = vrot.slane %v2333_v10, 2  ;;  %v615_v54 = vrot.slane %v2333_v10, 1 }
 0x14a   : > { %v2331_v15 = vmax.f32 %v483_v63, 0.0  ;;  %v924_v28 = vsel %vm873_vm3, %v921_v2, %v923_v12  ;;  %v926_v38 = vsel %vm873_vm3, %v923_v12, %v925_v33  ;;  %v738_v2 = vrot.slane %v2125_v52, 2 }
 0x14c   : > { %v487_v25 = vpop.f32.mrf.mxu3  ;;  %v770_v35 = vrot.slane %v2331_v15, 2  ;;  %v613_v9 = vrot.slane %v2331_v15, 1  ;;  %v739_v47 = vsel %vm716_vm1, %v736_v57, %v738_v2  ;;  %v927_v18 = vrot.slane %v2331_v15, 3 }
 0x14d   : > { %v488_v44 = vadd.f32 %v2031_v19, %v487_v25 }
 0x14e   : > { %v614_v63 = vsel %vm559_vm2, %v611_v14, %v613_v9  ;;  %v928_v25 = vsel %vm873_vm3, %v925_v33, %v927_v18  ;;  %v742_v33 = vrot.slane %v2150_v11, 2 }
 0x14f   : > { %1708 = vrot.lane.b32.xlu1 %v1707_v4, %s1903_s14  ;;  %v735_v4 = vsel %vm716_vm1, %v732_v27, %v734_v5  ;;  %v771_v27 = vsel %vm716_vm1, %v768_v50, %v770_v35  ;;  %v2357_v56 = vmax.f32 %v488_v44, 0.0 }
 0x150   : > { %1688 = vrot.lane.b32.xlu0 %v1687_v23, %s1905_s16  ;;  %v737_v23 = vsel %vm716_vm1, %v734_v5, %v736_v57 }
 0x151   : > { %v1752_v29 = vpack.i.bf16 %v737_v23, %v735_v4  ;;  %v929_v23 = vrot.slane %v2333_v10, 3  ;;  %v774_v4 = vrot.slane %v2357_v56, 2 }
 0x153   : > { %v775_v57 = vsel %vm716_vm1, %v772_v37, %v774_v4 }
 0x154   : > { %v490_v55 = vpop.f32.mrf.mxu3 }
 0x155   : > { %v491_v50 = vadd.f32 %v2031_v19, %v490_v55  ;;  %v743_v55 = vsel %vm716_vm1, %v740_v48, %v742_v33 }
 0x157   : > { %1723 = vrot.lane.b32.xlu1 %v1722_v39, %s1903_s14  ;;  %v1747_v39 = vpack.i.bf16 %v926_v38, %v924_v28  ;;  %v2362_v7 = vmax.f32 %v491_v50, 0.0  ;;  %v617_v38 = vrot.slane %v2357_v56, 1 }
 0x158   : > { %1703 = vrot.lane.b32.xlu0 %v1702_v41, %s1904_s15  ;;  %v773_v41 = vsel %vm716_vm1, %v770_v35, %v772_v37 }
 0x159   : > { %v1767_v43 = vpack.i.bf16 %v773_v41, %v771_v27  ;;  %v776_v14 = vrot.slane %v2362_v7, 2  ;;  %v744_v27 = vrot.slane %v2159_v21, 2 }
 0x15b   : > { %v745_v44 = vsel %vm716_vm1, %v742_v33, %v744_v27 }
 0x15c   : > { %v492_v12 = vpop.f32.mrf.mxu3  ;;  %v1812_v50 = vpack.i.bf16 %v745_v44, %v743_v55  ;;  %v2419_v55 = vld [vmem:[%s2652_s4] ss:$0 sm:$0xff] }
 0x15d   : > { %v493_v41 = vadd.f32 %v2031_v19, %v492_v12  ;;  %v931_v19 = vrot.slane %v2357_v56, 3 }
 0x15f   : > { %1738 = vrot.lane.b32.xlu1 %v1737_v1, %s1903_s14  ;;  %v741_v1 = vsel %vm716_vm1, %v738_v2, %v740_v48  ;;  %v526_v37 = vmax.f32 %v493_v41, 0.0 }
 0x160   : > { %1718 = vrot.lane.b32.xlu0 %v1717_v0, %s1905_s16  ;;  %v616_v0 = vsel %vm559_vm2, %v613_v9, %v615_v54  ;;  %v1782_v17 = vpack.i.bf16 %v741_v1, %v739_v47  ;;  %v933_v1 = vrot.slane %v2362_v7, 3  ;;  %v932_v47 = vsel %vm873_vm3, %v929_v23, %v931_v19 }
 0x161   : > { %v1762_v5 = vpack.i.bf16 %v616_v0, %v614_v63  ;;  %v746_v63 = vrot.slane %v2168_v36, 2  ;;  %v778_v0 = vrot.slane %v526_v37, 2 }
 0x163   : > { %v747_v48 = vsel %vm716_vm1, %v744_v27, %v746_v63  ;;  %v749_v12 = vsel %vm716_vm1, %v746_v63, %v748_v49 }
 0x167   : > { %1753 = vrot.lane.b32.xlu1 %v1752_v29, %s1903_s14  ;;  %v777_v29 = vsel %vm716_vm1, %v774_v4, %v776_v14 }
 0x168   : > { %1733 = vrot.lane.b32.xlu0 %v1732_v31, %s1904_s15  ;;  %v930_v31 = vsel %vm873_vm3, %v927_v18, %v929_v23  ;;  %v1797_v28 = vpack.i.bf16 %v777_v29, %v775_v57  ;;  %v935_v23 = vrot.slane %v526_v37, 3 }
 0x169   : > { %v1777_v35 = vpack.i.bf16 %v930_v31, %v928_v25  ;;  %v621_v25 = vrot.slane %v526_v37, 1 }
 0x16f   : > { %1768 = vrot.lane.b32.xlu1 %v1767_v43, %s1903_s14  ;;  %v618_v43 = vsel %vm559_vm2, %v615_v54, %v617_v38  ;;  %v1654_v54 = vpop.permute.xlu2 %1653 }
 0x170   : > { %1748 = vrot.lane.b32.xlu0 %v1747_v39, %s1905_s16  ;;  %v619_v39 = vrot.slane %v2362_v7, 1 }
 0x172   : > { %v620_v9 = vsel %vm559_vm2, %v617_v38, %v619_v39  ;;  %v622_v31 = vsel %vm559_vm2, %v619_v39, %v621_v25 }
 0x173   : > { %v1792_v2 = vpack.i.bf16 %v620_v9, %v618_v43  ;;  %v1822_v29 = vpack.i.bf16 %v2175_v42, %v622_v31 }
 0x177   : > { %1783 = vrot.lane.b32.xlu1 %v1782_v17, %s1903_s14  ;;  %v779_v17 = vsel %vm716_vm1, %v776_v14, %v778_v0  ;;  %v1669_v57 = vpop.permute.xlu2 %1668 }
 0x178   : > { %1763 = vrot.lane.b32.xlu0 %v1762_v5, %s1904_s15  ;;  %v934_v5 = vsel %vm873_vm3, %v931_v19, %v933_v1  ;;  %v1827_v4 = vpack.i.bf16 %v747_v48, %v779_v17 }
 0x179   : > { %v1807_v18 = vpack.i.bf16 %v934_v5, %v932_v47  ;;  %v1655_v47 = vunpack.i.l.bf16 %v1654_v54 }
 0x17b   : > { %v1032_v31 = vsel %vm357_vm0, %v2040_v26, %v1655_v47 }
 0x17f   : > { %1798 = vrot.lane.b32.xlu1 %v1797_v28, %s1903_s14  ;;  %v936_v28 = vsel %vm873_vm3, %v933_v1, %v935_v23  ;;  %v2406_v27 = vpop.permute.xlu2 %1683  ;;  %v1656_v1 = vunpack.i.h.bf16 %v1654_v54  ;;  %v1671_v54 = vunpack.i.h.bf16 %v1669_v57 }
 0x180   : > { %1778 = vrot.lane.b32.xlu0 %v1777_v35, %s1905_s16  ;;  %v1832_v38 = vpack.i.bf16 %v2178_v46, %v936_v28 }
 0x181   : > { %v1033_v25 = vsel %vm357_vm0, %v2061_v45, %v1656_v1 }
 0x187   : > { %1813 = vrot.lane.b32.xlu1 %v1812_v50, %s1903_s14  ;;  %v1699_v5 = vpop.permute.xlu2 %1698 }
 0x188   : > { %1793 = vrot.lane.b32.xlu0 %v1792_v2, %s1904_s15 }
 0x18f   : > { %1828 = vrot.lane.b32.xlu1 %v1827_v4, %s1903_s14 }
 0x190   : > { %1808 = vrot.lane.b32.xlu0 %v1807_v18, %s1905_s16 }
 0x197   : > { %810 = vrot.lane.b32.xlu1 %v749_v12, %s1903_s14  ;;  %s1567_s14 = smul.u32 248, %s1959_s22  ;;  %s1337_s22 = scalar_lea.sflag [#allocation3], %s215_s9 }
 0x198   : > { %1823 = vrot.lane.b32.xlu0 %v1822_v29, %s1904_s15  ;;  %v1670_v29 = vunpack.i.l.bf16 %v1669_v57 }
 0x199   : > { %v1629_v35 = vpop.permute.xlu1 %1628  ;;  %s1348_s17 = scalar_lea.hbm %s2653_s5, %s1567_s14 }
 0x19a   : > { %v1614_v14 = vpop.permute.xlu0 %1613  ;;  %v1631_v46 = vunpack.i.h.bf16 %v1629_v35  ;;  %v1630_v44 = vunpack.i.l.bf16 %v1629_v35  ;;  %s1351_s25 = sshll.u32 %s1348_s17, 4  ;;  %s1352_s25 = int_to_ptr.hbm [resolvable:$true] %s1351_s25 }
 0x19b   : > { %v1616_v41 = vunpack.i.h.bf16 %v1614_v14  ;;  %v1615_v42 = vunpack.i.l.bf16 %v1614_v14  ;;  %s1853_s26 = sshra.s32 %s1352_s25, 4  ;;  %s1854_s26 = int_to_ptr.hbm [resolvable:$true] %s1853_s26 }
 0x19c   : > { %s1855_s30 = scalar_lea.hbm %s1854_s26, 248  ;;  %p1860_p0 = scmp.lt.s32.totalorder %s1854_s26, %s2653_s5 }
 0x19d   : > { %v1047_v43 = vsel %vm357_vm0, %v2201_v6, %v1616_v41  ;;  %v1046_v9 = vsel %vm357_vm0, %v2185_v53, %v1615_v42  ;;  %p1856_p11 = scmp.ne.s32.totalorder %s1854_s26, %s1855_s30  ;;  %p1861_p1 = scmp.lt.s32.totalorder %s1859_s8, %s1855_s30 }
 0x19f   : > { %p1857_p12 = pnand %p1856_p11, %p1976_p5  ;;  %p1862_p2 = por %p1861_p1, %p1860_p0 }
 0x1a0   : > { %1833 = vrot.lane.b32.xlu0 %v1832_v38, %s1905_s16 }
 0x1a1   : > { %v1649_v49 = vpop.permute.xlu1 %1648  ;;  %p1858_p13 = pneg %p1857_p12 }
 0x1a2   : > { %v1619_v33 = vpop.permute.xlu0 %1618 }
 0x1a3   : > { %v1621_v39 = vunpack.i.h.bf16 %v1619_v33  ;;  %v1620_v37 = vunpack.i.l.bf16 %v1619_v33  ;;  %v1651_v33 = vunpack.i.h.bf16 %v1649_v49  ;;  %p1863_p3 = pnand %p1862_p2, %p1858_p13 }
 0x1a5   : > { %v1078_v2 = vsel %vm1061_vm4, %v1046_v9, %v1620_v37  ;;  %v1079_v50 = vsel %vm1061_vm4, %v1047_v43, %v1621_v39  ;;  %v1650_v39 = vunpack.i.l.bf16 %v1649_v49  ;;  %v1714_v9 = vpop.permute.xlu2 %1713 }
 0x1a6   : > { %v1110_v19 = vsel %vm1093_vm5, %v1078_v2, %v1630_v44  ;;  %v1111_v63 = vsel %vm1093_vm5, %v1079_v50, %v1631_v46 }
 0x1a7   : > { %v1226_v0 = vpop.f32.mrf.mxu1  ;;  %v1133_v6 = vpack.c.bf16 %v1111_v63, %v1110_v19 }
 0x1a8   : > { %v1227_v53 = vadd.f32 %v2419_v55, %v1226_v0  ;;  %v1685_v0 = vunpack.i.l.bf16 %v2406_v27 }
 0x1a9   : > { %1528 = vmatmul.msk.bf16.vlgmr.msra.gmra.mxu2 %vm1168_vm6, %v1133_v6  ;;  %v1664_v17 = vpop.permute.xlu1 %1663 }
 0x1aa   : > { %1305 = vst [vmem:[%s2427_s13] sm:$0xff] %v1227_v53  ;;  %v1644_v48 = vpop.permute.xlu0 %1643  ;;  %v1666_v18 = vunpack.i.h.bf16 %v1664_v17  ;;  %v1665_v4 = vunpack.i.l.bf16 %v1664_v17  ;;  %v1701_v17 = vunpack.i.h.bf16 %v1699_v5 }
 0x1ab   : > { %v1646_v23 = vunpack.i.h.bf16 %v1644_v48  ;;  %v1645_v12 = vunpack.i.l.bf16 %v1644_v48  ;;  %v1034_v48 = vsel %vm357_vm0, %v2067_v51, %v1685_v0 }
 0x1ac   : > { %v1065_v14 = vsel %vm1061_vm4, %v1033_v25, %v1666_v18  ;;  %v1064_v35 = vsel %vm1061_vm4, %v1032_v31, %v1665_v4  ;;  %v1700_v18 = vunpack.i.l.bf16 %v1699_v5 }
 0x1ad   : > { %v1096_v28 = vsel %vm1093_vm5, %v1064_v35, %v1670_v29  ;;  %v1097_v38 = vsel %vm1093_vm5, %v1065_v14, %v1671_v54  ;;  %v1049_v26 = vsel %vm357_vm0, %v2192_v60, %v1646_v23  ;;  %v1048_v57 = vsel %vm357_vm0, %v2190_v58, %v1645_v12  ;;  %v1729_v4 = vpop.permute.xlu2 %1728 }
 0x1ae   : > { %v1126_v42 = vpack.c.bf16 %v1097_v38, %v1096_v28  ;;  %v1080_v2 = vsel %vm1061_vm4, %v1048_v57, %v1650_v39  ;;  %v1081_v50 = vsel %vm1061_vm4, %v1049_v26, %v1651_v33  ;;  %v1686_v58 = vunpack.i.h.bf16 %v2406_v27 }
 0x1af   : > { %v1228_v41 = vpop.f32.mrf.mxu1  ;;  %v1716_v39 = vunpack.i.h.bf16 %v1714_v9 }
 0x1b0   : > { %v1229_v45 = vadd.f32 %v2419_v55, %v1228_v41  ;;  %1521 = vmatmul.msk.bf16.gmra.mxu1 %vm1168_vm6, %v1126_v42  ;;  %v1035_v53 = vsel %vm357_vm0, %v2077_v61, %v1686_v58 }
 0x1b1   : > { %v1679_v43 = vpop.permute.xlu1 %1678 }
 0x1b2   : > { %1306 = vst [vmem:[%s2427_s13 + $0x8] sm:$0xff] %v1229_v45  ;;  %v1659_v37 = vpop.permute.xlu0 %1658  ;;  %v1681_v5 = vunpack.i.h.bf16 %v1679_v43  ;;  %v1680_v14 = vunpack.i.l.bf16 %v1679_v43 }
 0x1b3   : > { %v1661_v46 = vunpack.i.h.bf16 %v1659_v37  ;;  %v1660_v44 = vunpack.i.l.bf16 %v1659_v37 }
 0x1b5   : > { %v1112_v19 = vsel %vm1093_vm5, %v1080_v2, %v1660_v44  ;;  %v1113_v60 = vsel %vm1093_vm5, %v1081_v50, %v1661_v46  ;;  %v1744_v33 = vpop.permute.xlu2 %1743  ;;  %v1037_v2 = vsel %vm357_vm0, %v2093_v13, %v1716_v39 }
 0x1b6   : > { %v1134_v63 = vpack.c.bf16 %v1113_v60, %v1112_v19  ;;  %v1731_v19 = vunpack.i.h.bf16 %v1729_v4  ;;  %v1730_v60 = vunpack.i.l.bf16 %v1729_v4 }
 0x1b9   : > { %1529 = vmatmul.msk.bf16.gmra.mxu2 %vm1168_vm6, %v1134_v63  ;;  %v1694_v6 = vpop.permute.xlu1 %1693 }
 0x1ba   : > { %v1674_v49 = vpop.permute.xlu0 %1673  ;;  %v1696_v1 = vunpack.i.h.bf16 %v1694_v6  ;;  %v1695_v47 = vunpack.i.l.bf16 %v1694_v6 }
 0x1bb   : > { %v1676_v25 = vunpack.i.h.bf16 %v1674_v49  ;;  %v1675_v31 = vunpack.i.l.bf16 %v1674_v49 }
 0x1bc   : > { %v1067_v54 = vsel %vm1061_vm4, %v1035_v53, %v1696_v1  ;;  %v1066_v27 = vsel %vm1061_vm4, %v1034_v48, %v1695_v47 }
 0x1bd   : > { %v1098_v29 = vsel %vm1093_vm5, %v1066_v27, %v1700_v18  ;;  %v1099_v23 = vsel %vm1093_vm5, %v1067_v54, %v1701_v17  ;;  %v1051_v61 = vsel %vm357_vm0, %v2247_v8, %v1676_v25  ;;  %v1050_v51 = vsel %vm357_vm0, %v2194_v62, %v1675_v31  ;;  %v1759_v47 = vpop.permute.xlu2 %1758 }
 0x1be   : > { %v1127_v12 = vpack.c.bf16 %v1099_v23, %v1098_v29  ;;  %v1082_v42 = vsel %vm1061_vm4, %v1050_v51, %v1680_v14  ;;  %v1083_v45 = vsel %vm1061_vm4, %v1051_v61, %v1681_v5  ;;  %v1715_v62 = vunpack.i.l.bf16 %v1714_v9 }
 0x1bf   : > { %v1746_v23 = vunpack.i.h.bf16 %v1744_v33 }
 0x1c0   : > { %1522 = vmatmul.msk.bf16.gmra.mxu1 %vm1168_vm6, %v1127_v12  ;;  %v1036_v50 = vsel %vm357_vm0, %v2083_v3, %v1715_v62  ;;  %v1745_v12 = vunpack.i.l.bf16 %v1744_v33 }
 0x1c1   : > { %v1709_v28 = vpop.permute.xlu1 %1708 }
 0x1c2   : > { %v1689_v35 = vpop.permute.xlu0 %1688  ;;  %v1711_v53 = vunpack.i.h.bf16 %v1709_v28  ;;  %v1710_v48 = vunpack.i.l.bf16 %v1709_v28  ;;  %v1038_v28 = vsel %vm357_vm0, %v2099_v20, %v1745_v12 }
 0x1c3   : > { %v1691_v38 = vunpack.i.h.bf16 %v1689_v35  ;;  %v1690_v41 = vunpack.i.l.bf16 %v1689_v35  ;;  %v1039_v35 = vsel %vm357_vm0, %v2109_v34, %v1746_v23 }
 0x1c5   : > { %v1114_v26 = vsel %vm1093_vm5, %v1082_v42, %v1690_v41  ;;  %v1115_v57 = vsel %vm1093_vm5, %v1083_v45, %v1691_v38  ;;  %v1774_v51 = vpop.permute.xlu2 %1773  ;;  %v1761_v38 = vunpack.i.h.bf16 %v1759_v47  ;;  %v1760_v41 = vunpack.i.l.bf16 %v1759_v47 }
 0x1c6   : > { %v1135_v8 = vpack.c.bf16 %v1115_v57, %v1114_v26 }
 0x1c9   : > { %1530 = vmatmul.msk.bf16.gmra.mxu2 %vm1168_vm6, %v1135_v8  ;;  %v1724_v43 = vpop.permute.xlu1 %1723 }
 0x1ca   : > { %v1704_v37 = vpop.permute.xlu0 %1703  ;;  %v1726_v46 = vunpack.i.h.bf16 %v1724_v43  ;;  %v1725_v44 = vunpack.i.l.bf16 %v1724_v43 }
 0x1cb   : > { %v1706_v63 = vunpack.i.h.bf16 %v1704_v37  ;;  %v1705_v58 = vunpack.i.l.bf16 %v1704_v37 }
 0x1cc   : > { %v1069_v0 = vsel %vm1061_vm4, %v1037_v2, %v1726_v46  ;;  %v1068_v9 = vsel %vm1061_vm4, %v1036_v50, %v1725_v44 }
 0x1cd   : > { %v1100_v49 = vsel %vm1093_vm5, %v1068_v9, %v1730_v60  ;;  %v1101_v6 = vsel %vm1093_vm5, %v1069_v0, %v1731_v19  ;;  %v1053_v13 = vsel %vm357_vm0, %v2279_v22, %v1706_v63  ;;  %v1052_v3 = vsel %vm357_vm0, %v2249_v16, %v1705_v58  ;;  %v1789_v60 = vpop.permute.xlu2 %1788 }
 0x1ce   : > { %v1128_v1 = vpack.c.bf16 %v1101_v6, %v1100_v49  ;;  %v1084_v31 = vsel %vm1061_vm4, %v1052_v3, %v1710_v48  ;;  %v1085_v54 = vsel %vm1061_vm4, %v1053_v13, %v1711_v53  ;;  %v1776_v0 = vunpack.i.h.bf16 %v1774_v51 }
 0x1cf   : > { %v1791_v3 = vunpack.i.h.bf16 %v1789_v60  ;;  %v1790_v53 = vunpack.i.l.bf16 %v1789_v60 }
 0x1d0   : > { %1523 = vmatmul.msk.bf16.gmra.mxu1 %vm1168_vm6, %v1128_v1  ;;  %v1041_v47 = vsel %vm357_vm0, %v2125_v52, %v1776_v0 }
 0x1d1   : > { %v1739_v18 = vpop.permute.xlu1 %1738 }
 0x1d2   : > { %v1719_v17 = vpop.permute.xlu0 %1718  ;;  %v1741_v20 = vunpack.i.h.bf16 %v1739_v18  ;;  %v1740_v37 = vunpack.i.l.bf16 %v1739_v18 }
 0x1d3   : > { %v1721_v4 = vunpack.i.h.bf16 %v1719_v17  ;;  %v1720_v25 = vunpack.i.l.bf16 %v1719_v17 }
 0x1d5   : > { %v1116_v27 = vsel %vm1093_vm5, %v1084_v31, %v1720_v25  ;;  %v1117_v29 = vsel %vm1093_vm5, %v1085_v54, %v1721_v4  ;;  %v1804_v54 = vpop.permute.xlu2 %1803 }
 0x1d6   : > { %v1136_v22 = vpack.c.bf16 %v1117_v29, %v1116_v27 }
 0x1d9   : > { %1531 = vmatmul.msk.bf16.gmra.mxu2 %vm1168_vm6, %v1136_v22  ;;  %v1754_v61 = vpop.permute.xlu1 %1753 }
 0x1da   : > { %v1734_v16 = vpop.permute.xlu0 %1733  ;;  %v1756_v5 = vunpack.i.h.bf16 %v1754_v61  ;;  %v1755_v14 = vunpack.i.l.bf16 %v1754_v61 }
 0x1db   : > { %v1736_v42 = vunpack.i.h.bf16 %v1734_v16  ;;  %v1735_v45 = vunpack.i.l.bf16 %v1734_v16 }
 0x1dc   : > { %v1071_v26 = vsel %vm1061_vm4, %v1039_v35, %v1756_v5  ;;  %v1070_v57 = vsel %vm1061_vm4, %v1038_v28, %v1755_v14  ;;  %v1806_v28 = vunpack.i.h.bf16 %v1804_v54 }
 0x1dd   : > { %v1102_v8 = vsel %vm1093_vm5, %v1070_v57, %v1760_v41  ;;  %v1103_v33 = vsel %vm1093_vm5, %v1071_v26, %v1761_v38  ;;  %v1055_v62 = vsel %vm357_vm0, %v2305_v32, %v1736_v42  ;;  %v1054_v34 = vsel %vm357_vm0, %v2281_v24, %v1735_v45 }
 0x1de   : > { %v1129_v39 = vpack.c.bf16 %v1103_v33, %v1102_v8  ;;  %v1086_v50 = vsel %vm1061_vm4, %v1054_v34, %v1740_v37  ;;  %v1087_v19 = vsel %vm1061_vm4, %v1055_v62, %v1741_v20  ;;  %v1775_v24 = vunpack.i.l.bf16 %v1774_v51 }
 0x1df   : > { %v1805_v38 = vunpack.i.l.bf16 %v1804_v54  ;;  %v1043_v57 = vsel %vm357_vm0, %v2150_v11, %v1806_v28 }
 0x1e0   : > { %1524 = vmatmul.msk.bf16.gmra.mxu1 %vm1168_vm6, %v1129_v39  ;;  %v1040_v13 = vsel %vm357_vm0, %v2115_v40, %v1775_v24 }
 0x1e1   : > { %v1769_v46 = vpop.permute.xlu1 %1768  ;;  %v1042_v8 = vsel %vm357_vm0, %v2131_v59, %v1805_v38 }
 0x1e2   : > { %v1749_v43 = vpop.permute.xlu0 %1748  ;;  %v1771_v29 = vunpack.i.h.bf16 %v1769_v46  ;;  %v1770_v22 = vunpack.i.l.bf16 %v1769_v46 }
 0x1e3   : > { %v1751_v44 = vunpack.i.h.bf16 %v1749_v43  ;;  %v1750_v2 = vunpack.i.l.bf16 %v1749_v43 }
 0x1e5   : > { %v1118_v63 = vsel %vm1093_vm5, %v1086_v50, %v1750_v2  ;;  %v1119_v32 = vsel %vm1093_vm5, %v1087_v19, %v1751_v44 }
 0x1e6   : > { %v1137_v58 = vpack.c.bf16 %v1119_v32, %v1118_v63 }
 0x1e9   : > { %1532 = vmatmul.msk.bf16.gmra.mxu2 %vm1168_vm6, %v1137_v58  ;;  %v1784_v49 = vpop.permute.xlu1 %1783 }
 0x1ea   : > { %v1764_v9 = vpop.permute.xlu0 %1763  ;;  %v1786_v6 = vunpack.i.h.bf16 %v1784_v49  ;;  %v1785_v1 = vunpack.i.l.bf16 %v1784_v49 }
 0x1eb   : > { %v1766_v48 = vunpack.i.h.bf16 %v1764_v9  ;;  %v1765_v17 = vunpack.i.l.bf16 %v1764_v9 }
 0x1ec   : > { %v1073_v18 = vsel %vm1061_vm4, %v1041_v47, %v1786_v6  ;;  %v1072_v4 = vsel %vm1061_vm4, %v1040_v13, %v1785_v1 }
 0x1ed   : > { %v1104_v25 = vsel %vm1093_vm5, %v1072_v4, %v1790_v53  ;;  %v1105_v31 = vsel %vm1093_vm5, %v1073_v18, %v1791_v3  ;;  %v1057_v52 = vsel %vm357_vm0, %v2331_v15, %v1766_v48  ;;  %v1056_v40 = vsel %vm357_vm0, %v2307_v30, %v1765_v17  ;;  %v1819_v30 = vpop.permute.xlu2 %1818 }
 0x1ee   : > { %v1130_v27 = vpack.c.bf16 %v1105_v31, %v1104_v25  ;;  %v1088_v51 = vsel %vm1061_vm4, %v1056_v40, %v1770_v22  ;;  %v1089_v5 = vsel %vm1061_vm4, %v1057_v52, %v1771_v29  ;;  %v1821_v33 = vunpack.i.h.bf16 %v1819_v30 }
 0x1ef   : > { %v1820_v39 = vunpack.i.l.bf16 %v1819_v30 }
 0x1f0   : > { %1525 = vmatmul.msk.bf16.gmra.mxu1 %vm1168_vm6, %v1130_v27 }
 0x1f1   : > { %v1799_v12 = vpop.permute.xlu1 %1798 }
 0x1f2   : > { %v1779_v23 = vpop.permute.xlu0 %1778  ;;  %v1801_v59 = vunpack.i.h.bf16 %v1799_v12  ;;  %v1800_v50 = vunpack.i.l.bf16 %v1799_v12 }
 0x1f3   : > { %v1781_v16 = vunpack.i.h.bf16 %v1779_v23  ;;  %v1780_v61 = vunpack.i.l.bf16 %v1779_v23 }
 0x1f5   : > { %v1120_v14 = vsel %vm1093_vm5, %v1088_v51, %v1780_v61  ;;  %v1121_v35 = vsel %vm1093_vm5, %v1089_v5, %v1781_v16 }
 0x1f6   : > { %v1138_v15 = vpack.c.bf16 %v1121_v35, %v1120_v14 }
 0x1f9   : > { %1533 = vmatmul.msk.bf16.gmra.mxu2 %vm1168_vm6, %v1138_v15  ;;  %v1814_v42 = vpop.permute.xlu1 %1813 }
 0x1fa   : > { %v1794_v41 = vpop.permute.xlu0 %1793  ;;  %v1816_v45 = vunpack.i.h.bf16 %v1814_v42  ;;  %v1815_v26 = vunpack.i.l.bf16 %v1814_v42 }
 0x1fb   : > { %v1796_v62 = vunpack.i.h.bf16 %v1794_v41  ;;  %v1795_v34 = vunpack.i.l.bf16 %v1794_v41 }
 0x1fc   : > { %v1075_v20 = vsel %vm1061_vm4, %v1043_v57, %v1816_v45  ;;  %v1074_v37 = vsel %vm1061_vm4, %v1042_v8, %v1815_v26 }
 0x1fd   : > { %v1106_v43 = vsel %vm1093_vm5, %v1074_v37, %v1820_v39  ;;  %v1107_v46 = vsel %vm1093_vm5, %v1075_v20, %v1821_v33  ;;  %v1059_v2 = vsel %vm357_vm0, %v2357_v56, %v1796_v62  ;;  %v1058_v11 = vsel %vm357_vm0, %v2333_v10, %v1795_v34  ;;  %v654_v10 = vpop.permute.xlu2 %653 }
 0x1fe   : > { %v1131_v44 = vpack.c.bf16 %v1107_v46, %v1106_v43  ;;  %v1090_v32 = vsel %vm1061_vm4, %v1058_v11, %v1800_v50  ;;  %v1091_v58 = vsel %vm1061_vm4, %v1059_v2, %v1801_v59  ;;  %v1045_v13 = vsel %vm357_vm0, %v2168_v36, %v654_v10 }
 0x200   : > { %1526 = vmatmul.msk.bf16.gmra.mxu1 %vm1168_vm6, %v1131_v44 }
 0x201   : > { %v1829_v0 = vpop.permute.xlu1 %1828 }
 0x202   : > { %v1809_v19 = vpop.permute.xlu0 %1808  ;;  %v1831_v48 = vunpack.i.h.bf16 %v1829_v0  ;;  %v1830_v17 = vunpack.i.l.bf16 %v1829_v0 }
 0x203   : > { %v1811_v60 = vunpack.i.h.bf16 %v1809_v19  ;;  %v1810_v63 = vunpack.i.l.bf16 %v1809_v19 }
 0x205   : > { %v1122_v24 = vsel %vm1093_vm5, %v1090_v32, %v1810_v63  ;;  %v1123_v9 = vsel %vm1093_vm5, %v1091_v58, %v1811_v60  ;;  %v968_v54 = vpop.permute.xlu2 %967 }
 0x206   : > { %v1139_v56 = vpack.c.bf16 %v1123_v9, %v1122_v24 }
 0x209   : > { %1534 = vmatmul.msk.bf16.gmra.mxu2 %vm1168_vm6, %v1139_v56  ;;  %v811_v47 = vpop.permute.xlu1 %810 }
 0x20a   : > { %v1824_v49 = vpop.permute.xlu0 %1823  ;;  %v1077_v18 = vsel %vm1061_vm4, %v1045_v13, %v811_v47 }
 0x20b   : > { %v1826_v6 = vunpack.i.h.bf16 %v1824_v49  ;;  %v1825_v1 = vunpack.i.l.bf16 %v1824_v49  ;;  %v1109_v52 = vsel %vm1093_vm5, %v1077_v18, %v968_v54 }
 0x20d   : > { %v1044_v3 = vsel %vm357_vm0, %v2159_v21, %v1826_v6  ;;  %v1060_v53 = vsel %vm357_vm0, %v2362_v7, %v1825_v1 }
 0x20e   : > { %v1076_v27 = vsel %vm1061_vm4, %v1044_v3, %v1831_v48  ;;  %v1092_v36 = vsel %vm1061_vm4, %v1060_v53, %v1830_v17 }
 0x212   : > { %v1834_v4 = vpop.permute.xlu0 %1833 }
 0x213   : > { %v1836_v25 = vunpack.i.h.bf16 %v1834_v4  ;;  %v1835_v31 = vunpack.i.l.bf16 %v1834_v4 }
 0x215   : > { %v1108_v21 = vsel %vm1093_vm5, %v1076_v27, %v1836_v25  ;;  %v1124_v7 = vsel %vm1093_vm5, %v1092_v36, %v1835_v31 }
 0x216   : > { %v1132_v40 = vpack.c.bf16 %v1109_v52, %v1108_v21  ;;  %v1140_v29 = vpack.c.bf16 %v1124_v7, %v1124_v7 }
 0x218   : > { %1527 = vmatmul.msk.bf16.gmra.mxu1 %vm1168_vm6, %v1132_v40 }
 0x219   : > { %1535 = vmatmul.msk.bf16.gmra.mxu2 %vm1168_vm6, %v1140_v29 }
 0x22c   : > { %v1266_v22 = vpop.f32.mrf.mxu2 }
 0x22d   : > { %v1267_v23 = vadd.f32 %v2419_v55, %v1266_v22  ;;  %v1231_v12 = vpop.f32.mrf.mxu1 }
 0x22e   : > { %v1232_v16 = vadd.f32 %v2419_v55, %v1231_v12 }
 0x22f   : > { %1321 = vst [vmem:[%s2427_s13 + $0x80] sm:$0xff] %v1267_v23 }
 0x230   : > { %1307 = vst [vmem:[%s2427_s13 + $0x10] sm:$0xff] %v1232_v16 }
 0x234   : > { %v1268_v61 = vpop.f32.mrf.mxu2 }
 0x235   : > { %v1269_v51 = vadd.f32 %v2419_v55, %v1268_v61  ;;  %v1233_v5 = vpop.f32.mrf.mxu1 }
 0x236   : > { %v1234_v14 = vadd.f32 %v2419_v55, %v1233_v5 }
 0x237   : > { %1322 = vst [vmem:[%s2427_s13 + $0x88] sm:$0xff] %v1269_v51 }
 0x238   : > { %1308 = vst [vmem:[%s2427_s13 + $0x18] sm:$0xff] %v1234_v14 }
 0x23c   : > { %v1271_v35 = vpop.f32.mrf.mxu2 }
 0x23d   : > { %v1272_v15 = vadd.f32 %v2419_v55, %v1271_v35  ;;  %v1236_v28 = vpop.f32.mrf.mxu1 }
 0x23e   : > { %v1237_v38 = vadd.f32 %v2419_v55, %v1236_v28 }
 0x23f   : > { %1323 = vst [vmem:[%s2427_s13 + $0x90] sm:$0xff] %v1272_v15 }
 0x240   : > { %1309 = vst [vmem:[%s2427_s13 + $0x20] sm:$0xff] %v1237_v38 }
 0x244   : > { %v1273_v30 = vpop.f32.mrf.mxu2 }
 0x245   : > { %v1274_v41 = vadd.f32 %v2419_v55, %v1273_v30  ;;  %v1238_v42 = vpop.f32.mrf.mxu1 }
 0x246   : > { %v1239_v45 = vadd.f32 %v2419_v55, %v1238_v42 }
 0x247   : > { %1324 = vst [vmem:[%s2427_s13 + $0x98] sm:$0xff] %v1274_v41 }
 0x248   : > { %1310 = vst [vmem:[%s2427_s13 + $0x28] sm:$0xff] %v1239_v45 }
 0x24c   : > { %v1276_v26 = vpop.f32.mrf.mxu2 }
 0x24d   : > { %v1277_v57 = vadd.f32 %v2419_v55, %v1276_v26  ;;  %v1241_v8 = vpop.f32.mrf.mxu1 }
 0x24e   : > { %v1242_v33 = vadd.f32 %v2419_v55, %v1241_v8 }
 0x24f   : > { %1325 = vst [vmem:[%s2427_s13 + $0xa0] sm:$0xff] %v1277_v57 }
 0x250   : > { %1311 = vst [vmem:[%s2427_s13 + $0x30] sm:$0xff] %v1242_v33 }
 0x254   : > { %v1278_v39 = vpop.f32.mrf.mxu2 }
 0x255   : > { %v1279_v62 = vadd.f32 %v2419_v55, %v1278_v39  ;;  %v1243_v34 = vpop.f32.mrf.mxu1 }
 0x256   : > { %v1244_v20 = vadd.f32 %v2419_v55, %v1243_v34 }
 0x257   : > { %1326 = vst [vmem:[%s2427_s13 + $0xa8] sm:$0xff] %v1279_v62 }
 0x258   : > { %1312 = vst [vmem:[%s2427_s13 + $0x38] sm:$0xff] %v1244_v20 }
 0x25c   : > { %v1281_v37 = vpop.f32.mrf.mxu2 }
 0x25d   : > { %v1282_v43 = vadd.f32 %v2419_v55, %v1281_v37  ;;  %v1246_v46 = vpop.f32.mrf.mxu1 }
 0x25e   : > { %v1247_v44 = vadd.f32 %v2419_v55, %v1246_v46 }
 0x25f   : > { %1327 = vst [vmem:[%s2427_s13 + $0xb0] sm:$0xff] %v1282_v43 }
 0x260   : > { %1313 = vst [vmem:[%s2427_s13 + $0x40] sm:$0xff] %v1247_v44 }
 0x264   : > { %v1283_v2 = vpop.f32.mrf.mxu2 }
 0x265   : > { %v1284_v11 = vadd.f32 %v2419_v55, %v1283_v2  ;;  %v1248_v59 = vpop.f32.mrf.mxu1 }
 0x266   : > { %v1249_v50 = vadd.f32 %v2419_v55, %v1248_v59 }
 0x267   : > { %1328 = vst [vmem:[%s2427_s13 + $0xb8] sm:$0xff] %v1284_v11 }
 0x268   : > { %1314 = vst [vmem:[%s2427_s13 + $0x48] sm:$0xff] %v1249_v50 }
 0x26c   : > { %v1286_v19 = vpop.f32.mrf.mxu2 }
 0x26d   : > { %v1287_v60 = vadd.f32 %v2419_v55, %v1286_v19  ;;  %v1251_v63 = vpop.f32.mrf.mxu1 }
 0x26e   : > { %v1252_v32 = vadd.f32 %v2419_v55, %v1251_v63 }
 0x26f   : > { %1329 = vst [vmem:[%s2427_s13 + $0xc0] sm:$0xff] %v1287_v60 }
 0x270   : > { %1315 = vst [vmem:[%s2427_s13 + $0x50] sm:$0xff] %v1252_v32 }
 0x274   : > { %v1288_v58 = vpop.f32.mrf.mxu2 }
 0x275   : > { %v1289_v0 = vadd.f32 %v2419_v55, %v1288_v58  ;;  %v1253_v24 = vpop.f32.mrf.mxu1 }
 0x276   : > { %v1254_v9 = vadd.f32 %v2419_v55, %v1253_v24 }
 0x277   : > { %1330 = vst [vmem:[%s2427_s13 + $0xc8] sm:$0xff] %v1289_v0 }
 0x278   : > { %1316 = vst [vmem:[%s2427_s13 + $0x58] sm:$0xff] %v1254_v9 }
 0x27c   : > { %v1291_v56 = vpop.f32.mrf.mxu2 }
 0x27d   : > { %v1292_v10 = vadd.f32 %v2419_v55, %v1291_v56  ;;  %v1256_v49 = vpop.f32.mrf.mxu1 }
 0x27e   : > { %v1257_v6 = vadd.f32 %v2419_v55, %v1256_v49 }
 0x27f   : > { %1331 = vst [vmem:[%s2427_s13 + $0xd0] sm:$0xff] %v1292_v10 }
 0x280   : > { %1317 = vst [vmem:[%s2427_s13 + $0x60] sm:$0xff] %v1257_v6 }
 0x284   : > { %v1293_v1 = vpop.f32.mrf.mxu2 }
 0x285   : > { %v1294_v47 = vadd.f32 %v2419_v55, %v1293_v1  ;;  %v1258_v13 = vpop.f32.mrf.mxu1 }
 0x286   : > { %v1259_v3 = vadd.f32 %v2419_v55, %v1258_v13 }
 0x287   : > { %1332 = vst [vmem:[%s2427_s13 + $0xd8] sm:$0xff] %v1294_v47 }
 0x288   : > { %1318 = vst [vmem:[%s2427_s13 + $0x68] sm:$0xff] %v1259_v3 }
 0x28c   : > { %v1296_v53 = vpop.f32.mrf.mxu2 }
 0x28d   : > { %v1297_v48 = vadd.f32 %v2419_v55, %v1296_v53 }
 0x28f   : > { %1333 = vst [vmem:[%s2427_s13 + $0xe0] sm:$0xff] %v1297_v48 }
 0x294   : > { %v1298_v17 = vpop.f32.mrf.mxu2 }
 0x295   : > { %v1299_v18 = vadd.f32 %v2419_v55, %v1298_v17  ;;  %v1261_v4 = vpop.f32.mrf.mxu1 }
 0x296   : > { %v1262_v25 = vadd.f32 %v2419_v55, %v1261_v4 }
 0x297   : > { %1334 = vst [vmem:[%s2427_s13 + $0xe8] sm:$0xff] %v1299_v18 }
 0x298   : > { %1319 = vst [vmem:[%s2427_s13 + $0x70] sm:$0xff] %v1262_v25 }
 0x29c   : > { %v1301_v31 = vpop.f32.mrf.mxu2 }
 0x29d   : > { %v1302_v54 = vadd.f32 %v2419_v55, %v1301_v31  ;;  %v1263_v27 = vpop.f32.mrf.mxu1 }
 0x29e   : > { %v1264_v36 = vadd.f32 %v2419_v55, %v1263_v27 }
 0x29f   : > { %1335 = vst [vmem:[%s2427_s13 + $0xf0] sm:$0xff] %v1302_v54 }
 0x2a0   : > { %1320 = vst [vmem:[%s2427_s13 + $0x78] sm:$0xff] %v1264_v36 }
 0x2a1   : > { %1866 = shalt.err (!%p1863_p3)
}
 0x2a2   : > { %s1906_s9 = smov 128   ;;  %s1907_s12 = smov 8  }
 0x2a3   : > { %1568 = dma.vmem_to_hbm [thread:$0]  (%p1976_p5), %s1350_s23, 3968, %s1352_s25, %s1337_s22, %s1906_s9, %s1906_s9, %s1907_s12  }
 0x2a4   : > { %v1303_v55 = vpop.f32.mrf.mxu2 }
 0x2a5 PF: > { %p1574_p4 = scmp.ge.s32.totalorder %s1901_s21, 2  ;;  %s1366_s13 = sand.u32 1, %s1889_s18  }
 0x2a6   : > { %s1367_s14 = scalar_lea.sflag [#allocation3], %s1366_s13 }
 0x2a7   : > { %p1571_p7 = pnand %p1574_p4, %p1980_p6 }
 0x2a9   : > { %p1572_p8 = pneg %p1571_p7 }
 0x2ab   : > { %1884 = dma.done.wait (%p1572_p8), %s1367_s14, 3968  }
 0x2ac   : > { %1886 = vsyncadd (%p1572_p8), %s1367_s14, 4294963328  ;;  %p15_p9 = scmp.ge.s32.totalorder %s1963_s24, 4   ;;  %s2656_s18 = smov %s1893_s19 }
 0x2ad   : > { %s2657_s19 = smov %s1897_s20  ;;  %s2658_s20 = smov %s1974_s27 }
 0x2ae   : > { %s2659_s21 = smov %s1963_s24  ;;  %17 = sbr.rel (!%p15_p9) target bundleno = 3 (0x3), region = 75 }
 0x2b3   :  { %1373 = vsyncpa [#allocation3], 1 }
 0x2b4   :  { %1375 = vsyncpa [#allocation3 + $0x1], 1 }

</bundles_post_ra>
